<compile_context>
chip_gen: v6e
topology: v6e:2x2x1
jax: 0.10.0
libtpu: 0.0.40
codegen_flags: <defaults>
</compile_context>

<pallas_src>
import jax
import jax.numpy as jnp
from jax.experimental import pallas as pl
from jax.experimental.pallas import tpu as pltpu

LANES = 128
_BLOCK_BYTES = 2 * 1024 * 1024  # ~2 MiB/block: safe on v5e/v6e/v7x scoped VMEM


def _sublane_tile(dtype):
    # Native packed sublane tile: (8,128) f32, (16,128) bf16, (32,128) int8/fp8.
    return {1: 32, 2: 16, 4: 8}.get(jnp.dtype(dtype).itemsize, 8)


# ----------------------------------------------------------------------------
# Zero-traffic identity: output aliases input, nothing is copied.
# ----------------------------------------------------------------------------
def _identity_alias_kernel(x_ref, o_ref):
    # Output buffer IS the input buffer (input_output_aliases); only a fake
    # read+write dependency is needed so the aliased output counts as written.
    del x_ref
    pltpu.touch(o_ref)


def _identity_noop(x):
    return pl.pallas_call(
        _identity_alias_kernel,
        out_shape=jax.ShapeDtypeStruct(x.shape, x.dtype),
        in_specs=[pl.BlockSpec(memory_space=pl.ANY)],
        out_specs=pl.BlockSpec(memory_space=pl.ANY),
        input_output_aliases={0: 0},
    )(x)


# ----------------------------------------------------------------------------
# Streaming-copy identity (fallback / fresh-output variant).
# ----------------------------------------------------------------------------
def _copy_block_kernel(x_ref, o_ref):
    o_ref[...] = x_ref[...]


def _identity_streaming_copy(x):
    orig_shape = x.shape
    n = x.size
    if n == 0:
        return x

    rows = -(-n // LANES)                     # ceil(n / 128)
    padded_len = rows * LANES
    needs_pad = padded_len != n
    if needs_pad:
        # TODO(synk): mask the tail inside the kernel (pltpu.store with a lane
        # mask on the last block) to avoid this extra pad/slice HBM pass.
        flat = jnp.pad(x.reshape(-1), (0, padded_len - n))
    else:
        flat = x.reshape(-1)                  # metadata-only reshape
    x2d = flat.reshape(rows, LANES)

    itemsize = jnp.dtype(x.dtype).itemsize
    tile = _sublane_tile(x.dtype)
    budget_rows = _BLOCK_BYTES // (LANES * itemsize)
    budget_rows = max(tile, (budget_rows // tile) * tile)

    if rows <= budget_rows:
        block_rows = rows                     # full-array block (always legal)
        grid = (1,)
    else:
        block_rows = budget_rows              # multiple of native sublane tile
        grid = (pl.cdiv(rows, block_rows),)   # ragged last block handled by Pallas

    out2d = pl.pallas_call(
        _copy_block_kernel,
        out_shape=jax.ShapeDtypeStruct(x2d.shape, x2d.dtype),
        grid_spec=pltpu.PrefetchScalarGridSpec(
            num_scalar_prefetch=0,
            grid=grid,
            in_specs=[pl.BlockSpec((block_rows, LANES), lambda i: (i, 0))],
            out_specs=pl.BlockSpec((block_rows, LANES), lambda i: (i, 0)),
        ),
        compiler_params=pltpu.CompilerParams(
            dimension_semantics=("parallel",)),  # shards across TCs on v7x
    )(x2d)

    if needs_pad:
        return out2d.reshape(-1)[:n].reshape(orig_shape)
    return out2d.reshape(orig_shape)


def your_model_forward(x):
    """Pallas implementation of YourModel.forward (identity)."""
    if x.size == 0:
        return x
    try:
        # Fast path: aliased no-op kernel, zero HBM traffic.
        return _identity_noop(x)
    except Exception:
        # Robust fallback: bandwidth-roofline streaming copy (still correct).
        return _identity_streaming_copy(x)


if __name__ == "__main__":
    key = jax.random.PRNGKey(0)
    x = jax.random.normal(key, (2, 4, 16, 16), dtype=jnp.float32)

    y = your_model_forward(x)
    jax.block_until_ready(y)
    assert y.shape == x.shape and y.dtype == x.dtype
    assert bool(jnp.array_equal(y, x))

    # Also exercise the streaming-copy variant: aligned shape and a shape
    # whose flat size is not a multiple of 128 (tail-pad path).
    y2 = _identity_streaming_copy(x)
    x_odd = jax.random.normal(jax.random.PRNGKey(1), (3, 5, 7), dtype=jnp.float32)
    y3 = _identity_streaming_copy(x_odd)
    jax.block_until_ready((y2, y3))
    assert bool(jnp.array_equal(y2, x))
    assert y3.shape == x_odd.shape and bool(jnp.array_equal(y3, x_odd))

    print("KERNEL_OK")
</pallas_src>

<mosaic_0001>
module attributes {stable_mosaic.version = 11 : i64} {
  func.func @_identity_alias_kernel(%arg0: memref<2x4x16x16xf32, #tpu.memory_space<any>>, %arg1: memref<2x4x16x16xf32, #tpu.memory_space<any>>) attributes {dimension_semantics = [], scalar_prefetch = 0 : i64, scratch_operands = 0 : i64, tpu.core_type = #tpu.core_type<tc>} {
    return
  }
}

module attributes {stable_mosaic.version = 11 : i64} {
  func.func @_copy_block_kernel(%arg0: i32, %arg1: memref<16x128xf32, #tpu.memory_space<vmem>>, %arg2: memref<16x128xf32, #tpu.memory_space<vmem>>) attributes {dimension_semantics = [#tpu.dimension_semantics<parallel>], iteration_bounds = array<i64: 1>, scalar_prefetch = 0 : i64, scratch_operands = 0 : i64, tpu.core_type = #tpu.core_type<tc>, window_params = [{transform_indices = @transform_0, window_bounds = array<i64: 16, 128>}, {transform_indices = @transform_1, window_bounds = array<i64: 16, 128>}]} {
    %c0 = arith.constant 0 : index
    %c0_0 = arith.constant 0 : index
    %0 = vector.load %arg1[%c0, %c0_0] : memref<16x128xf32, #tpu.memory_space<vmem>>, vector<16x128xf32>
    %c0_1 = arith.constant 0 : index
    %c0_2 = arith.constant 0 : index
    %1 = vector.load %arg2[%c0_1, %c0_2] : memref<16x128xf32, #tpu.memory_space<vmem>>, vector<16x128xf32>
    tpu.vector_store %arg2[%c0_1, %c0_2], %0 {strides = array<i32>} : memref<16x128xf32, #tpu.memory_space<vmem>>, vector<16x128xf32>,
    return
  }
  func.func @transform_0(%arg0: i32) -> (i32, i32) {
    %c0_i32 = arith.constant 0 : i32
    %c0_i32_0 = arith.constant 0 : i32
    return %arg0, %c0_i32 : i32, i32
  }
  func.func @transform_1(%arg0: i32) -> (i32, i32) {
    %c0_i32 = arith.constant 0 : i32
    %c0_i32_0 = arith.constant 0 : i32
    return %arg0, %c0_i32 : i32, i32
  }
}

</mosaic_0001>

<bundles_post_ra>
// kernel: tpu_custom_call.1
= control target key start
LH: loop header
LB: loop body
LE: loop exit
PB: predicated region body
PF: predicated region fallthrough
CT: control target
= control target key end

     0   :  { %s16_s0 = inlined_call_operand.hbm [shape: f32[2,4,16,16], index: 0, kind: input, shape index: {}, may-alias: {0,1}]   ;;  %s17_s1 = inlined_call_operand.hbm [shape: f32[2,4,16,16], index: 1, kind: output, shape index: {}, may-alias: {0,1}]  }

// kernel: tpu_custom_call.1
= control target key start
LH: loop header
LB: loop body
LE: loop exit
PB: predicated region body
PF: predicated region fallthrough
CT: control target
= control target key end

     0   :  { %6 = vsyncpa [#allocation3], 0  ;;  %s112_s0 = inlined_call_operand.hbm [shape: f32[16,128], index: 0, kind: input, shape index: {}]   ;;  %s113_s1 = inlined_call_operand.hbm [shape: f32[16,128], index: 1, kind: output, shape index: {}]  }
   0x1   :  { %7 = vsyncpa [#allocation4], 0  ;;  %s92_s6 = smov [#allocation2]  }
   0x2   :  { %s13_s7 = sshll.u32 %s92_s6, 4  ;;  %s14_s7 = int_to_ptr.vmem [resolvable:$true] %s13_s7 }
   0x3   :  { %s56_s8 = scalar_lea.vmem %s14_s7, 256  ;;  %p61_p1 = scmp.lt.s32.totalorder %s14_s7, %s14_s7 }
   0x4   :  { %p57_p0 = scmp.ne.s32.totalorder %s14_s7, %s56_s8  ;;  %p62_p2 = scmp.lt.s32.totalorder %s56_s8, %s56_s8 }
   0x6   :  { %p63_p3 = por %p62_p2, %p61_p1 }
   0x8   :  { %p64_p4 = pnand %p63_p3, %p57_p0 }
   0xa   :  { %67 = shalt.err (!%p64_p4)
}
   0xb   :  { %s93_s9 = smov 128   ;;  %s94_s10 = smov 8  }
   0xc   :  { %19 = dma.hbm_to_vmem [thread:$0]  %s112_s0, 256, %s14_s7, [#allocation3], %s93_s9, %s93_s9, %s94_s10  }
   0xd   :  { %88 = dma.done.wait [#allocation3], 256  }
   0xe   :  { %89 = vsyncadd [#allocation3], 4294967040  ;;  %s95_s13 = smov [#allocation5]   ;;  %v23_v0 = vld [vmem:[#allocation2] sm:$0xff]  ;;  %v24_v1 = vld [vmem:[#allocation2 + $0x8] sm:$0xff] }
   0xf   :  { %s32_s14 = sshll.u32 %s95_s13, 4  ;;  %25 = vst [vmem:[#allocation5] sm:$0xff] %v23_v0  ;;  %26 = vst [vmem:[#allocation5 + $0x8] sm:$0xff] %v24_v1  ;;  %s33_s14 = int_to_ptr.vmem [resolvable:$true] %s32_s14 }
  0x10   :  { %s68_s15 = scalar_lea.vmem %s33_s14, 256  ;;  %p73_p6 = scmp.lt.s32.totalorder %s33_s14, %s33_s14 }
  0x11   :  { %p69_p5 = scmp.ne.s32.totalorder %s33_s14, %s68_s15  ;;  %p74_p7 = scmp.lt.s32.totalorder %s68_s15, %s68_s15 }
  0x13   :  { %p75_p8 = por %p74_p7, %p73_p6 }
  0x15   :  { %p76_p9 = pnand %p75_p8, %p69_p5 }
  0x17   :  { %79 = shalt.err (!%p76_p9)
}
  0x18   :  { %38 = dma.vmem_to_hbm [thread:$0]  %s33_s14, 256, %s113_s1, [#allocation4], %s93_s9, %s93_s9, %s94_s10  }
  0x19   :  { %90 = dma.done.wait [#allocation4], 256  }
  0x1a   :  { %91 = vsyncadd [#allocation4], 4294967040 }
  0x1b   :  { %42 = vsyncpa [#allocation3], 1 }
  0x1c   :  { %43 = vsyncpa [#allocation4], 1 }

</bundles_post_ra>
